<compile_context>
chip_gen: v7x
topology: tpu7x:2x2x1
jax: 0.10.0
libtpu: 0.0.40
codegen_flags: <defaults>
</compile_context>

<pallas_src>
import functools

import jax
import jax.numpy as jnp
from jax import lax
from jax.experimental import pallas as pl
from jax.experimental.pallas import tpu as pltpu


def _contrastive_loss_kernel(x_ref, lab_row_ref, lab_col_ref, out_ref, *,
                             inv_temperature: float):
    x = x_ref[...].astype(jnp.float32)                     # (n, d) f32 work copy
    n = x.shape[0]

    # ---- row normalization (N*D work; EUP rsqrt) --------------------------
    # Clamping ||a|| >= 1e-4 per row matches F.cosine_similarity's
    # max(||a||*||b||, 1e-8) per pair for all non-degenerate rows.
    sumsq = jnp.sum(x * x, axis=1, keepdims=True)           # (n, 1)
    inv_norm = lax.rsqrt(jnp.maximum(sumsq, jnp.float32(1e-8)))
    xn = x * inv_norm                                        # unit rows

    # ---- Gram matrix on the MXU (no transpose of the (N, D) operand) ------
    # Feed bf16 operands when the input is already bf16 (full rate on v6e/v7x);
    # accumulate in f32 either way.
    xn_mm = xn.astype(jnp.bfloat16) if x_ref.dtype == jnp.bfloat16 else xn
    sim = lax.dot_general(xn_mm, xn_mm, (((1,), (1,)), ((), ())),
                          preferred_element_type=jnp.float32)  # (n, n) cosine sims

    # ---- masks (pure VPU compares) -----------------------------------------
    lab_row = lab_row_ref[...]                               # (1, n) int32
    lab_col = lab_col_ref[...]                               # (n, 1) int32
    same_label = lab_col == lab_row                          # (n, n) bool
    row_i = lax.broadcasted_iota(jnp.int32, (n, n), 0)
    col_i = lax.broadcasted_iota(jnp.int32, (n, n), 1)
    pos_mask = same_label & (row_i != col_i)                 # positive pairs (off-diag)

    # ---- exp(sim / T) with the temperature folded into a constant multiply -
    e = jnp.exp(sim * jnp.float32(inv_temperature))          # (n, n), EUP

    # ---- denominator: per-row sum over different-label partners ------------
    neg = jnp.where(same_label, 0.0, e)                      # (1-mask)*sim_exp
    no_sim_sum = jnp.sum(neg, axis=1, keepdims=True)         # (n, 1)
    # Original checks sum(no_sim_sum broadcast to (n,n)) == 0, i.e. n*sum == 0.
    zero_check = jnp.sum(no_sim_sum)

    # (n,1) is a single vreg: exact reciprocal here is negligible cost and
    # keeps the 1/0 -> inf behaviour of the reference for degenerate rows.
    inv_sum = pl.reciprocal(no_sim_sum)                      # (n, 1)

    # ---- fused loss matrix:  -log(mask_no_sim + sim/sim_sum + eye) ---------
    #   diff-label / diagonal entries -> -log(1) = 0
    #   positive pairs                -> -log(exp(sim/T) / no_sim_sum[row])
    loss_arg = jnp.where(pos_mask, e * inv_sum, 1.0)
    loss_mat = -jnp.log(loss_arg)

    # nnz via the same `!= 0` test the PyTorch code (torch.nonzero) uses.
    nnz = jnp.sum((loss_mat != 0.0).astype(jnp.float32))
    loss = jnp.sum(loss_mat) / (nnz + jnp.float32(1e-5))

    result = jnp.where(zero_check == 0.0, jnp.float32(0.0), loss)
    out_ref[...] = jnp.broadcast_to(result, (1, 1)).astype(jnp.float32)


def ailwq_contrastive_loss(enc_features: jax.Array,
                           labels: jax.Array,
                           temperature: float = 0.5) -> jax.Array:
    """Pallas TPU implementation of AILWQ_ContrastiveLoss.forward.

    enc_features: (N, D) float array (f32 or bf16)
    labels:       (N,)   integer class ids (already mapped to ints)
    returns scalar float32 loss.
    """
    n, d = enc_features.shape
    labels_i32 = labels.astype(jnp.int32)
    lab_row = labels_i32.reshape(1, n)   # lane-major copy
    lab_col = labels_i32.reshape(n, 1)   # sublane-major copy

    # Size the scoped-VMEM cap from the actual footprint (a few N^2 f32
    # buffers); capped at 100 MiB.  For N large enough to approach this, the
    # monolithic design should be replaced by a row-parallel tiled grid
    # (mandatory on v7x's 64 MiB VMEM) -- out of scope for these batch sizes.
    itemsize = jnp.dtype(enc_features.dtype).itemsize
    est = 6 * n * n * 4 + 2 * n * d * itemsize + (1 << 20)
    vmem_limit = int(min(max(32 << 20, 2 * est), 100 << 20))

    out = pl.pallas_call(
        functools.partial(_contrastive_loss_kernel,
                          inv_temperature=float(1.0 / temperature)),
        out_shape=jax.ShapeDtypeStruct((1, 1), jnp.float32),
        in_specs=[
            pl.BlockSpec((n, d), lambda: (0, 0)),
            pl.BlockSpec((1, n), lambda: (0, 0)),
            pl.BlockSpec((n, 1), lambda: (0, 0)),
        ],
        out_specs=pl.BlockSpec((1, 1), lambda: (0, 0)),
        compiler_params=pltpu.CompilerParams(vmem_limit_bytes=vmem_limit),
    )(enc_features, lab_row, lab_col)
    return out[0, 0]


def _reference_loss(x, labels, temperature=0.5):
    """Pure-JAX reference mirroring the PyTorch module, for sanity checking."""
    n = x.shape[0]
    x = x.astype(jnp.float32)
    dots = x @ x.T
    norms = jnp.sqrt(jnp.sum(x * x, axis=1, keepdims=True))
    S = dots / jnp.maximum(norms * norms.T, 1e-8)
    mask = (labels[:, None] == labels[None, :]).astype(jnp.float32)
    eye = jnp.eye(n, dtype=jnp.float32)
    sim_exp = jnp.exp(S / temperature) * (1.0 - eye)
    sim = mask * sim_exp
    no_sim_sum = jnp.sum(sim_exp - sim, axis=1, keepdims=True)
    sim_sum = jnp.broadcast_to(no_sim_sum, (n, n))
    loss_mat = -jnp.log((1.0 - mask) + sim / sim_sum + eye)
    nnz = jnp.sum((loss_mat != 0.0).astype(jnp.float32))
    loss = jnp.sum(loss_mat) / (nnz + 1e-5)
    return jnp.where(jnp.sum(sim_sum) == 0.0, 0.0, loss)


if __name__ == "__main__":
    key = jax.random.PRNGKey(0)
    n, d = 8, 32
    enc_features = jax.random.normal(key, (n, d), dtype=jnp.float32)
    # integer labels with repeats so the positive-pair mask is non-trivial
    labels = jnp.array([0, 0, 1, 1, 2, 2, 3, 3], dtype=jnp.int32)

    # f32 path
    loss = ailwq_contrastive_loss(enc_features, labels, temperature=0.5)
    loss = jax.block_until_ready(loss)
    ref = _reference_loss(enc_features, labels, temperature=0.5)
    assert jnp.allclose(loss, ref, rtol=1e-3, atol=1e-6), (loss, ref)

    # bf16 path (bf16 operands into the MXU, f32 elsewhere) -- looser tolerance
    enc_bf16 = enc_features.astype(jnp.bfloat16)
    loss_bf16 = ailwq_contrastive_loss(enc_bf16, labels, temperature=0.5)
    loss_bf16 = jax.block_until_ready(loss_bf16)
    ref_bf16 = _reference_loss(enc_bf16.astype(jnp.float32), labels, temperature=0.5)
    assert jnp.allclose(loss_bf16, ref_bf16, rtol=5e-2, atol=2e-2), (loss_bf16, ref_bf16)

    print("KERNEL_OK")
</pallas_src>

<mosaic_0001>
module attributes {stable_mosaic.version = 11 : i64} {
  func.func @_contrastive_loss_kernel(%arg0: memref<8x32xf32, #tpu.memory_space<vmem>>, %arg1: memref<1x8xi32, #tpu.memory_space<vmem>>, %arg2: memref<8x1xi32, #tpu.memory_space<vmem>>, %arg3: memref<1x1xf32, #tpu.memory_space<vmem>>) attributes {dimension_semantics = [], scalar_prefetch = 0 : i64, scratch_operands = 0 : i64, tpu.core_type = #tpu.core_type<tc>} {
    %c0 = arith.constant 0 : index
    %c0_0 = arith.constant 0 : index
    %0 = vector.load %arg0[%c0, %c0_0] : memref<8x32xf32, #tpu.memory_space<vmem>>, vector<8x32xf32>
    %1 = arith.mulf %0, %0 : vector<8x32xf32>
    %cst = arith.constant dense<0.000000e+00> : vector<8xf32>
    %2 = vector.multi_reduction <add>, %1, %cst [1] : vector<8x32xf32> to vector<8xf32>
    %3 = vector.shape_cast %2 : vector<8xf32> to vector<8x1xf32>
    %cst_1 = arith.constant 9.99999993E-9 : f32
    %4 = vector.broadcast %cst_1 : f32 to vector<8x1xf32>
    %5 = arith.maximumf %3, %4 : vector<8x1xf32>
    %6 = math.rsqrt %5 : vector<8x1xf32>
    %7 = vector.broadcast %6 : vector<8x1xf32> to vector<8x32xf32>
    %8 = arith.mulf %0, %7 : vector<8x32xf32>
    %cst_2 = arith.constant dense<0.000000e+00> : vector<8x8xf32>
    %9 = tpu.matmul %8, %8, %cst_2 {dimension_numbers = #tpu.dot_dimension_numbers<[1], [1], [0], [0], [0, 0, 1, 0], [], []>} : vector<8x32xf32>, vector<8x32xf32>, vector<8x8xf32> -> vector<8x8xf32>
    %c0_3 = arith.constant 0 : index
    %c0_4 = arith.constant 0 : index
    %10 = vector.load %arg1[%c0_3, %c0_4] : memref<1x8xi32, #tpu.memory_space<vmem>>, vector<1x8xi32>
    %c0_5 = arith.constant 0 : index
    %c0_6 = arith.constant 0 : index
    %11 = vector.load %arg2[%c0_5, %c0_6] : memref<8x1xi32, #tpu.memory_space<vmem>>, vector<8x1xi32>
    %12 = vector.broadcast %11 : vector<8x1xi32> to vector<8x8xi32>
    %13 = vector.broadcast %10 : vector<1x8xi32> to vector<8x8xi32>
    %14 = arith.cmpi eq, %12, %13 : vector<8x8xi32>
    %15 = tpu.iota {dimensions = array<i32: 0>} : vector<8x8xi32>
    %16 = tpu.iota {dimensions = array<i32: 1>} : vector<8x8xi32>
    %17 = arith.cmpi ne, %15, %16 : vector<8x8xi32>
    %18 = arith.andi %14, %17 : vector<8x8xi1>
    %cst_7 = arith.constant 2.000000e+00 : f32
    %19 = vector.broadcast %cst_7 : f32 to vector<8x8xf32>
    %20 = arith.mulf %9, %19 : vector<8x8xf32>
    %21 = math.exp %20 : vector<8x8xf32>
    %cst_8 = arith.constant 0.000000e+00 : f32
    %22 = vector.broadcast %cst_8 : f32 to vector<8x8xf32>
    %23 = arith.select %14, %22, %21 : vector<8x8xi1>, vector<8x8xf32>
    %cst_9 = arith.constant dense<0.000000e+00> : vector<8xf32>
    %24 = vector.multi_reduction <add>, %23, %cst_9 [1] : vector<8x8xf32> to vector<8xf32>
    %25 = vector.shape_cast %24 : vector<8xf32> to vector<8x1xf32>
    %26 = vector.shape_cast %25 : vector<8x1xf32> to vector<1x8x1xf32>
    %cst_10 = arith.constant dense<0.000000e+00> : vector<1xf32>
    %27 = vector.multi_reduction <add>, %26, %cst_10 [1, 2] : vector<1x8x1xf32> to vector<1xf32>
    %28 = vector.shape_cast %27 : vector<1xf32> to vector<1x1x1xf32>
    %29 = vector.extract %28[0, 0, 0] : f32 from vector<1x1x1xf32>
    %30 = tpu.reciprocal %25 : vector<8x1xf32> -> vector<8x1xf32>
    %31 = vector.broadcast %30 : vector<8x1xf32> to vector<8x8xf32>
    %32 = arith.mulf %21, %31 : vector<8x8xf32>
    %cst_11 = arith.constant 1.000000e+00 : f32
    %33 = vector.broadcast %cst_11 : f32 to vector<8x8xf32>
    %34 = arith.select %18, %32, %33 : vector<8x8xi1>, vector<8x8xf32>
    %35 = math.log %34 : vector<8x8xf32>
    %cst_12 = arith.constant 0.000000e+00 : f32
    %36 = vector.broadcast %cst_12 : f32 to vector<8x8xf32>
    %37 = arith.subf %36, %35 : vector<8x8xf32>
    %cst_13 = arith.constant 0.000000e+00 : f32
    %38 = vector.broadcast %cst_13 : f32 to vector<8x8xf32>
    %39 = arith.cmpf one, %37, %38 : vector<8x8xf32>
    %40 = arith.extui %39 : vector<8x8xi1> to vector<8x8xi32>
    %41 = arith.sitofp %40 : vector<8x8xi32> to vector<8x8xf32>
    %42 = vector.shape_cast %41 : vector<8x8xf32> to vector<1x8x8xf32>
    %cst_14 = arith.constant dense<0.000000e+00> : vector<1xf32>
    %43 = vector.multi_reduction <add>, %42, %cst_14 [1, 2] : vector<1x8x8xf32> to vector<1xf32>
    %44 = vector.shape_cast %43 : vector<1xf32> to vector<1x1x1xf32>
    %45 = vector.extract %44[0, 0, 0] : f32 from vector<1x1x1xf32>
    %46 = vector.shape_cast %37 : vector<8x8xf32> to vector<1x8x8xf32>
    %cst_15 = arith.constant dense<0.000000e+00> : vector<1xf32>
    %47 = vector.multi_reduction <add>, %46, %cst_15 [1, 2] : vector<1x8x8xf32> to vector<1xf32>
    %48 = vector.shape_cast %47 : vector<1xf32> to vector<1x1x1xf32>
    %49 = vector.extract %48[0, 0, 0] : f32 from vector<1x1x1xf32>
    %cst_16 = arith.constant 9.99999974E-6 : f32
    %50 = arith.addf %45, %cst_16 : f32
    %51 = arith.divf %49, %50 : f32
    %cst_17 = arith.constant 0.000000e+00 : f32
    %52 = arith.cmpf oeq, %29, %cst_17 : f32
    %cst_18 = arith.constant 0.000000e+00 : f32
    %53 = arith.select %52, %cst_18, %51 : f32
    %54 = vector.broadcast %53 : f32 to vector<1x1xf32>
    %c0_19 = arith.constant 0 : index
    %c0_20 = arith.constant 0 : index
    %55 = vector.load %arg3[%c0_19, %c0_20] : memref<1x1xf32, #tpu.memory_space<vmem>>, vector<1x1xf32>
    tpu.vector_store %arg3[%c0_19, %c0_20], %54 {strides = array<i32>} : memref<1x1xf32, #tpu.memory_space<vmem>>, vector<1x1xf32>,
    return
  }
}

</mosaic_0001>

<bundles_post_ra>
// kernel: tpu_custom_call.1
= control target key start
LH: loop header
LB: loop body
LE: loop exit
PB: predicated region body
PF: predicated region fallthrough
CT: control target
= control target key end

     0   :  { %vm17_vm0 = vcmask 261120   ;;  %s296_s0 = inlined_call_operand.vmem [shape: f32[8,32], index: 0, kind: input, shape index: {}]   ;;  %s297_s1 = inlined_call_operand.vmem [shape: s32[1,8], index: 1, kind: input, shape index: {}]   ;;  %s298_s2 = inlined_call_operand.vmem [shape: s32[8,1], index: 2, kind: input, shape index: {}]   ;;  %s299_s3 = inlined_call_operand.hbm [shape: f32[1,1], index: 3, kind: output, shape index: {}]  }
   0x1   :  { %v15_v0 = vld [vmem:[%s296_s0] sm:$0xff] }
   0x2   :  { %8 = vsyncpa [#allocation3], 0  ;;  %v16_v1 = vmul.f32 %v15_v0, %v15_v0  ;;  %v243_v3 = vmov 0.0   ;;  %vm244_vm1 = vmmov 0   ;;  %v98_v4 = vld [vmem:[%s298_s2] sm:$0xff]  ;;  %v245_v5 = vmov 0  }
   0x3   :  { %191 = vmatprep.subr.mxu0 %v243_v3  ;;  %193 = vmatprep.mubr.msk.f32.mxu0 %vm244_vm1, %v243_v3  ;;  %v187_v14 = vld [vmem:[%s297_s1] ss:$0 sm:$0xff]  ;;  %vm117_vm3 = vcmask 64512   ;;  %vm121_vm4 = vcmask 7168   ;;  %v107_v21 = vlaneseq  ;;  %s246_s20 = smov [#allocation2]   ;;  %vm169_vm8 = vcmask 0  }
   0x4   :  { %v18_v2 = vsel %vm17_vm0, %v16_v1, 0.0  ;;  %208 = vset.pattern.permute.xlu0 %v245_v5  ;;  %s177_s21 = sshll.u32 %s246_s20, 4  ;;  %s178_s21 = int_to_ptr.vmem [resolvable:$true] %s177_s21 }
   0x5   :  { %19 = vadd.xlane.f32.xlu0 %v18_v2  ;;  %v108_v22 = vshrl.u32 %v107_v21, 7  ;;  %v110_v23 = vand.u32 127, %v107_v21  ;;  %s219_s23 = scalar_lea.vmem %s178_s21, 16  ;;  %s223_s24 = scalar_lea.vmem %s178_s21, 32 }
   0x6   :  { %p220_p1 = scmp.ne.s32.totalorder %s178_s21, %s219_s23  ;;  %p224_p2 = scmp.lt.s32.totalorder %s178_s21, %s178_s21 }
   0x7   :  { %vm111_vm5 = vcmp.ne.s32.totalorder %v108_v22, %v110_v23  ;;  %p225_p3 = scmp.lt.s32.totalorder %s223_s24, %s219_s23 }
   0x9   :  { %p226_p4 = por %p225_p3, %p224_p2 }
   0xb   :  { %p227_p5 = pnand %p226_p4, %p220_p1 }
  0x1b   :  { %100 = vperm.xlu0 %208, %v98_v4  }
  0x92   :  { %v20_v6 = vpop.xlane.xlu0 %19 }
  0x93   :  { %v21_v7 = vmax.f32 %v20_v6, 1e-08 }
  0x95   :  { %209 = vrsqrt.f32 %v21_v7 }
  0x9a   :  { %v101_v15 = vpop.permute.xlu0 %100 }
  0x9b   :  { %vm106_vm2 = vcmp.eq.s32.totalorder %v101_v15, %v187_v14 }
  0x9c   :  { %vm112_vm6 = vmand %vm106_vm2, %vm111_vm5 }
  0x9f   :  { %v210_v8 = vpop.eup %209 }
  0xa0   :  { %v23_v9 = vmul.f32 %v210_v8, %v15_v0 }
  0xa2   :  { %192 = vmatpush3.xpose.msk.msra.mxu0 %vm17_vm0, %v23_v9 }
  0xa5   :  { %194 = vmatmul.mubr.msk.f32.vlgmr.msra.gmra.mrb[0].mxu0 %vm17_vm0, %v23_v9 }
 0x178   :  { %v93_v10 = vpop.f32.mrb[0].mxu0 }
 0x179   :  { %v113_v11 = vmul.f32 2.0, %v93_v10  ;;  %v195_v12 = vpop.f32.mrb[1].mxu0 }
 0x17b   :  { %v114_v13 = vmul.f32 1.442695, %v113_v11 }
 0x17d   :  { %211 = vpow2.f32 %v114_v13 }
 0x187   :  { %v212_v16 = vpop.eup %211 }
 0x188   :  { %v116_v17 = vsel %vm106_vm2, 0.0, %v212_v16 }
 0x189   :  { %v118_v18 = vsel %vm117_vm3, %v116_v17, 0.0 }
 0x18a   :  { %119 = vadd.xlane.f32.xlu1 %v118_v18 }
 0x217   :  { %v120_v19 = vpop.xlane.xlu1 %119 }
 0x218   :  { %213 = vrcp.f32 %v120_v19  ;;  %v122_v20 = vsel %vm121_vm4, %v120_v19, 0.0 }
 0x219   :  { %123 = vadd.xlane.f32.xlu1 %v122_v20 }
 0x222   :  { %v214_v24 = vpop.eup %213 }
 0x223   :  { %v133_v25 = vmul.f32 %v214_v24, %v212_v16 }
 0x225   :  { %v134_v26 = vsel %vm112_vm6, %v133_v25, 1.0 }
 0x226   :  { %215 = vlog2.f32 %v134_v26 }
 0x230   :  { %v216_v27 = vpop.eup %215 }
 0x231   :  { %v136_v28 = vmul.f32 0.6931472, %v216_v27 }
 0x233   :  { %v137_v29 = vsub.f32 0.0, %v136_v28 }
 0x235   :  { %vm138_vm7 = vcmp.ne.f32.partialorder %v137_v29, 0.0  ;;  %v151_v32 = vsel %vm117_vm3, %v137_v29, 0.0 }
 0x236   :  { %v188_v30 = vsel %vm138_vm7, 1.0, %v243_v3 }
 0x237   :  { %v141_v31 = vsel %vm117_vm3, %v188_v30, 0.0 }
 0x238   :  { %142 = vadd.xlane.f32.xlu1 %v141_v31 }
 0x23c   :  { %152 = vadd.xlane.f32.xlu1 %v151_v32 }
 0x2a6   :  { %v124_v33 = vpop.xlane.xlu1 %123 }
 0x2a7   :  { %v125_v34 = vrot.slane %v124_v33, 4 }
 0x2a9   :  { %v126_v35 = vadd.f32 %v125_v34, %v124_v33 }
 0x2ab   :  { %v127_v36 = vrot.slane %v126_v35, 2 }
 0x2ad   :  { %v128_v37 = vadd.f32 %v127_v36, %v126_v35 }
 0x2af   :  { %v129_v38 = vrot.slane %v128_v37, 1 }
 0x2b1   :  { %v130_v39 = vadd.f32 %v129_v38, %v128_v37 }
 0x2b3   :  { %196 = vpush %v130_v39 }
 0x2c5   :  { %v143_v40 = vpop.xlane.xlu1 %142 }
 0x2c6   :  { %v144_v41 = vrot.slane %v143_v40, 4 }
 0x2c8   :  { %v145_v42 = vadd.f32 %v144_v41, %v143_v40 }
 0x2c9   :  { %v153_v43 = vpop.xlane.xlu1 %152 }
 0x2ca   :  { %v146_v44 = vrot.slane %v145_v42, 2  ;;  %v154_v45 = vrot.slane %v153_v43, 4 }
 0x2cc   :  { %v155_v46 = vadd.f32 %v154_v45, %v153_v43  ;;  %v147_v47 = vadd.f32 %v146_v44, %v145_v42 }
 0x2ce   :  { %v156_v48 = vrot.slane %v155_v46, 2  ;;  %v148_v49 = vrot.slane %v147_v47, 1 }
 0x2d0   :  { %v157_v50 = vadd.f32 %v156_v48, %v155_v46  ;;  %v149_v51 = vadd.f32 %v148_v49, %v147_v47 }
 0x2d2   :  { %198 = vpush %v149_v51  ;;  %v158_v52 = vrot.slane %v157_v50, 1 }
 0x2d4   :  { %v159_v53 = vadd.f32 %v158_v52, %v157_v50 }
 0x2d6   :  { %200 = vpush %v159_v53 }
 0x2e4   :  { %s197_s1 = spop %196 }
 0x2e5   :  { %p166_p0 = scmp.eq.f32.partialorder %s197_s1, 0.0 }
 0x303   :  { %s199_s2 = spop %198 }
 0x304   :  { %s161_s17 = sadd.f32 1e-05, %s199_s2 }
 0x306   :  { %v162_v54 = vstv %s161_s17 }
 0x307   :  { %217 = vrcp.f32 %v162_v54  ;;  %s201_s18 = spop %200 }
 0x311   :  { %v218_v55 = vpop.eup %217 }
 0x312   :  { %202 = vpush %v218_v55 }
 0x343   :  { %s203_s19 = spop %202 }
 0x344   :  { %s165_s22 = smul.f32 %s203_s19, %s201_s18 }
 0x346   :  { %s301_s22 = smov (%p166_p0, %s165_s22), 0.0 }
 0x347   :  { %v168_v56 = vstv %s301_s22 }
 0x348   :  { %170 = vst.msk [vmem:[#allocation2] sm:$0x1] %vm169_vm8, %v168_v56 }
 0x349   :  { %230 = shalt.err (!%p227_p5)
}
 0x34a   :  { %s231_s27 = scalar_lea.hbm %s299_s3, 16 }
 0x34b   :  { %p232_p6 = scmp.ne.s32.totalorder %s299_s3, %s231_s27  ;;  %p235_p7 = scmp.lt.u32.totalorder %s231_s27, %s299_s3 }
 0x34d   :  { %p237_p8 = pnand %p235_p7, %p232_p6 }
 0x34f   :  { %240 = shalt.err (!%p237_p8)
}
 0x350   :  { %180 = dma.vmem_to_hbm [thread:$0]  %s178_s21, 16, %s299_s3, [#allocation3]  }
 0x351   :  { %241 = dma.done.wait [#allocation3], 16  }
 0x352   :  { %242 = vsyncadd [#allocation3], 4294967280 }
 0x353   :  { %184 = vsyncpa [#allocation3], 1 }

</bundles_post_ra>
